<compile_context>
chip_gen: v6e
topology: v6e:2x2x1
jax: 0.10.0
libtpu: 0.0.40
codegen_flags: <defaults>
</compile_context>

<pallas_src>
import functools

import jax
import jax.numpy as jnp
from jax.experimental import pallas as pl
from jax.experimental.pallas import tpu as pltpu


def _round_up(x, m):
    return (x + m - 1) // m * m


def _vmem_capacity_bytes():
    try:
        return int(pltpu.get_tpu_info().vmem_capacity_bytes)
    except Exception:
        return 64 * 1024 * 1024  # conservative (v7x-sized) fallback


def _lane_fold(a, width=128):
    """Sum 128-lane groups of `a` (rows, cols) into (rows, width) with aligned vreg adds."""
    _, cols = a.shape
    acc = a[:, :width]
    for g in range(1, cols // width):
        acc = acc + a[:, g * width:(g + 1) * width]
    return acc


def _loss_kernel(x_ref, t_ref, o_ref, s_ref, n_ref, *,
                 upper_bound, norm, num_pixels, pixel_tile):
    j = pl.program_id(1)  # pixel-tile index within the current image

    @pl.when(j == 0)
    def _():  # reset per-image per-class accumulators
        s_ref[...] = jnp.zeros_like(s_ref)
        n_ref[...] = jnp.zeros_like(n_ref)

    x = x_ref[0].astype(jnp.float32)   # (C, TP) logits, classes on sublanes
    t = t_ref[0]                       # (1, TP) int32 labels

    C, TP = x.shape

    # ---- per-pixel log-softmax pieces over the class (sublane) axis ----
    m = jnp.max(x, axis=0, keepdims=True)                          # (1, TP)
    lse = jnp.log(jnp.sum(jnp.exp(x - m), axis=0, keepdims=True))  # (1, TP)

    # ---- selection mask: one-hot(label) AND lane-in-bounds ----
    # ignore_index (255 >= C) never matches the class iota; ragged-tail lanes
    # (global pixel index >= P) are masked here instead of via a host-side pad.
    cls = jax.lax.broadcasted_iota(jnp.int32, (C, 1), 0)           # (C, 1)
    lane = jax.lax.broadcasted_iota(jnp.int32, (1, TP), 1)         # (1, TP)
    valid = (j * pixel_tile + lane) < num_pixels                   # (1, TP)
    sel = (cls == t) & valid                                       # (C, TP) bool

    # target logit gathered via masked sublane reduce (select, not multiply);
    # the full (C, TP) logp tile is never materialized.
    x_t = jnp.sum(jnp.where(sel, x, 0.0), axis=0, keepdims=True)   # (1, TP)
    logp_t = x_t - m - lse                                         # (1, TP)

    # ---- per-class lane-parallel partials: counts and summed target log-probs ----
    contrib_n = jnp.where(sel, 1.0, 0.0)                           # (C, TP)
    contrib_s = jnp.where(sel, logp_t, 0.0)                        # (C, TP)
    n_ref[...] += _lane_fold(contrib_n)                            # (C, 128)
    s_ref[...] += _lane_fold(contrib_s)                            # (C, 128)
    # TODO(synk): if bundle dumps show vld/vst saturation at very large tiles,
    # strip-mine the pixel axis inside the kernel to bound intermediate live ranges.

    @pl.when(j == pl.num_programs(1) - 1)
    def _():
        counts = jnp.sum(n_ref[...], axis=1, keepdims=True)        # (C, 1)
        s_cls = jnp.sum(s_ref[...], axis=1, keepdims=True)         # (C, 1)
        total = jnp.sum(counts)
        # TODO(synk): np.histogram would put a label exactly == num_classes into
        # the last bin; we assume labels are in [0, C) or == ignore_index.
        hist = counts / jnp.maximum(total, 1.0)
        if norm:
            w = jnp.where(hist != 0.0,
                          upper_bound / jnp.maximum(hist, 1e-30), 0.0) + 1.0
        else:
            w = jnp.where(hist != 0.0, upper_bound * (1.0 - hist), 0.0) + 1.0

        num = jnp.sum(w * s_cls)
        den = jnp.sum(w * counts)
        # guard: an all-ignored image would give 0/0 in the PyTorch original
        loss_i = jnp.where(den > 0.0, -num / den, 0.0)
        o_ref[...] = jnp.zeros_like(o_ref) + loss_i


def image_based_cross_entropy_loss_2d(
    logits_nchw,
    targets_nhw,
    *,
    upper_bound=1.0,
    ignore_index=255,
    norm=False,
    pixel_tile=None,
):
    """JAX/Pallas equivalent of ImageBasedCrossEntropyLoss2d.forward (per-image weights)."""
    N, C, H, W = logits_nchw.shape
    P = H * W

    # one-hot trick relies on ignore labels (and any out-of-bounds garbage >= C)
    # never matching a valid class index.
    assert C <= ignore_index, "num_classes must be <= ignore_index for this kernel"

    # ---- VMEM-budget-aware pixel tile (v7x: 64 MiB VMEM, v5e/v6e: 128 MiB) ----
    vmem_cap = _vmem_capacity_bytes()
    vmem_limit = min((3 * vmem_cap) // 4, 100 * 1024 * 1024)
    if pixel_tile is None:
        c_pad = _round_up(C, 8)
        itemsize = jnp.dtype(logits_nchw.dtype).itemsize
        # double-buffered logits tile + ~4 f32 (C, TP) temporaries + targets
        per_pixel = c_pad * (2 * itemsize + 16) + 64
        budget = vmem_limit // 2
        tp = max(128, (budget // per_pixel) // 128 * 128)
        pixel_tile = int(min(tp, _round_up(P, 128), 32768))
    else:
        pixel_tile = _round_up(int(pixel_tile), 128)
    num_tiles = -(-P // pixel_tile)

    # free reshape of NCHW -> (N, C, P): pixels on lanes, classes on sublanes.
    # Keep the input dtype (e.g. bf16) for the HBM->VMEM transfer; cast in-kernel.
    # No padding pass: ragged tail handled in-kernel by the lane-validity mask.
    x = logits_nchw.reshape(N, C, P)
    # TODO(synk): targets could be shipped as uint8 (C <= 255) to shave HBM traffic
    # on v5e; kept int32 here for maximal lowering robustness.
    t = targets_nhw.reshape(N, 1, P).astype(jnp.int32)

    kernel = functools.partial(
        _loss_kernel,
        upper_bound=float(upper_bound),
        norm=bool(norm),
        num_pixels=int(P),
        pixel_tile=int(pixel_tile),
    )

    per_image = pl.pallas_call(
        kernel,
        out_shape=jax.ShapeDtypeStruct((N, 1, 1), jnp.float32),
        grid_spec=pltpu.PrefetchScalarGridSpec(
            num_scalar_prefetch=0,
            grid=(N, num_tiles),
            in_specs=[
                pl.BlockSpec((1, C, pixel_tile), lambda i, j: (i, 0, j)),
                pl.BlockSpec((1, 1, pixel_tile), lambda i, j: (i, 0, j)),
            ],
            out_specs=pl.BlockSpec((1, 1, 1), lambda i, j: (i, 0, 0)),
            scratch_shapes=[
                pltpu.VMEM((C, 128), jnp.float32),   # S_c lane-parallel partials
                pltpu.VMEM((C, 128), jnp.float32),   # N_c lane-parallel partials
            ],
        ),
        compiler_params=pltpu.CompilerParams(
            # image axis can shard across TensorCores; pixel axis carries the
            # per-image accumulator so it must be "arbitrary".
            # TODO(synk): on v7x an explicit core split (pltpu.CORE_PARALLEL or a
            # core_map over the pixel range) is needed to reliably use both TCs.
            dimension_semantics=("parallel", "arbitrary"),
            vmem_limit_bytes=int(vmem_limit),
        ),
    )(x, t)
    return jnp.sum(per_image)


# ---------------- pure-JAX reference (for correctness check) ----------------
def _reference_loss(logits_nchw, targets_nhw, *, upper_bound=1.0, ignore_index=255, norm=False):
    N, C, H, W = logits_nchw.shape
    total = jnp.float32(0.0)
    for i in range(N):
        x = logits_nchw[i].astype(jnp.float32)          # (C, H, W)
        t = targets_nhw[i].astype(jnp.int32)            # (H, W)
        logp = jax.nn.log_softmax(x, axis=0)            # over class dim

        in_range = (t >= 0) & (t < C)
        counts = jnp.zeros((C,), jnp.float32).at[jnp.where(in_range, t, 0)].add(
            in_range.astype(jnp.float32)
        )
        hist = counts / jnp.maximum(jnp.sum(counts), 1.0)
        if norm:
            w = jnp.where(hist != 0.0, upper_bound / jnp.maximum(hist, 1e-30), 0.0) + 1.0
        else:
            w = jnp.where(hist != 0.0, upper_bound * (1.0 - hist), 0.0) + 1.0

        valid = (t != ignore_index)
        t_safe = jnp.where(valid, t, 0)
        logp_t = jnp.take_along_axis(logp, t_safe[None], axis=0)[0]
        w_t = w[t_safe]
        vf = valid.astype(jnp.float32)
        total = total + (-jnp.sum(vf * w_t * logp_t) / jnp.sum(vf * w_t))
    return total


if __name__ == "__main__":
    key = jax.random.PRNGKey(0)

    # ---- test 1: divisible pixel count, multiple pixel tiles per image ----
    k1, k2, k3 = jax.random.split(key, 3)
    N, C, H, W = 2, 4, 16, 16
    logits = jax.random.normal(k1, (N, C, H, W), dtype=jnp.float32)
    targets = jax.random.randint(k2, (N, H, W), 0, C, dtype=jnp.int32)
    ignore_mask = jax.random.uniform(k3, (N, H, W)) < 0.1
    targets = jnp.where(ignore_mask, 255, targets)

    loss = jax.block_until_ready(
        image_based_cross_entropy_loss_2d(logits, targets, pixel_tile=128)
    )
    ref = jax.block_until_ready(_reference_loss(logits, targets))
    assert jnp.allclose(loss, ref, rtol=1e-4, atol=1e-4), (loss, ref)

    # ---- test 2: ragged tail (P=200 not a multiple of 128), multi-tile ----
    k4, k5, k6 = jax.random.split(jax.random.PRNGKey(1), 3)
    N2, C2, H2, W2 = 2, 5, 10, 20
    logits2 = jax.random.normal(k4, (N2, C2, H2, W2), dtype=jnp.float32)
    targets2 = jax.random.randint(k5, (N2, H2, W2), 0, C2, dtype=jnp.int32)
    ignore_mask2 = jax.random.uniform(k6, (N2, H2, W2)) < 0.1
    targets2 = jnp.where(ignore_mask2, 255, targets2)

    loss2 = jax.block_until_ready(
        image_based_cross_entropy_loss_2d(logits2, targets2, pixel_tile=128)
    )
    ref2 = jax.block_until_ready(_reference_loss(logits2, targets2))
    assert jnp.allclose(loss2, ref2, rtol=1e-4, atol=1e-4), (loss2, ref2)

    # ---- test 3: default (VMEM-budget-derived) pixel tile, single ragged block ----
    loss3 = jax.block_until_ready(image_based_cross_entropy_loss_2d(logits2, targets2))
    assert jnp.allclose(loss3, ref2, rtol=1e-4, atol=1e-4), (loss3, ref2)

    print("KERNEL_OK")
</pallas_src>

<mosaic_0001>
module attributes {stable_mosaic.version = 11 : i64} {
  func.func @_loss_kernel(%arg0: i32, %arg1: i32, %arg2: memref<1x4x128xf32, #tpu.memory_space<vmem>>, %arg3: memref<1x1x128xi32, #tpu.memory_space<vmem>>, %arg4: memref<1x1x1xf32, #tpu.memory_space<vmem>>, %arg5: memref<4x128xf32, #tpu.memory_space<vmem>>, %arg6: memref<4x128xf32, #tpu.memory_space<vmem>>) attributes {dimension_semantics = [#tpu.dimension_semantics<parallel>, #tpu.dimension_semantics<arbitrary>], iteration_bounds = array<i64: 2, 2>, scalar_prefetch = 0 : i64, scratch_operands = 2 : i64, tpu.core_type = #tpu.core_type<tc>, window_params = [{transform_indices = @transform_0, window_bounds = array<i64: 1, 4, 128>}, {transform_indices = @transform_1, window_bounds = array<i64: 1, 1, 128>}, {transform_indices = @transform_2, window_bounds = array<i64: 1, 1, 1>}]} {
    %c0_i32 = arith.constant 0 : i32
    %0 = arith.cmpi eq, %arg1, %c0_i32 : i32
    %1 = arith.extui %0 : i1 to i32
    %c0_i32_0 = arith.constant 0 : i32
    %2 = arith.cmpi ne, %1, %c0_i32_0 : i32
    scf.if %2 {
      %cst_21 = arith.constant 0.000000e+00 : f32
      %49 = vector.broadcast %cst_21 : f32 to vector<4x128xf32>
      %c0_22 = arith.constant 0 : index
      %c0_23 = arith.constant 0 : index
      %50 = vector.load %arg5[%c0_22, %c0_23] : memref<4x128xf32, #tpu.memory_space<vmem>>, vector<4x128xf32>
      tpu.vector_store %arg5[%c0_22, %c0_23], %49 {strides = array<i32>} : memref<4x128xf32, #tpu.memory_space<vmem>>, vector<4x128xf32>,
      %cst_24 = arith.constant 0.000000e+00 : f32
      %51 = vector.broadcast %cst_24 : f32 to vector<4x128xf32>
      %c0_25 = arith.constant 0 : index
      %c0_26 = arith.constant 0 : index
      %52 = vector.load %arg6[%c0_25, %c0_26] : memref<4x128xf32, #tpu.memory_space<vmem>>, vector<4x128xf32>
      tpu.vector_store %arg6[%c0_25, %c0_26], %51 {strides = array<i32>} : memref<4x128xf32, #tpu.memory_space<vmem>>, vector<4x128xf32>,
    } else {
    }
    %c0 = arith.constant 0 : index
    %c0_1 = arith.constant 0 : index
    %c0_2 = arith.constant 0 : index
    %3 = vector.load %arg2[%c0, %c0_1, %c0_2] : memref<1x4x128xf32, #tpu.memory_space<vmem>>, vector<1x4x128xf32>
    %4 = vector.shape_cast %3 : vector<1x4x128xf32> to vector<4x128xf32>
    %c0_3 = arith.constant 0 : index
    %c0_4 = arith.constant 0 : index
    %c0_5 = arith.constant 0 : index
    %5 = vector.load %arg3[%c0_3, %c0_4, %c0_5] : memref<1x1x128xi32, #tpu.memory_space<vmem>>, vector<1x1x128xi32>
    %6 = vector.shape_cast %5 : vector<1x1x128xi32> to vector<1x128xi32>
    %cst = arith.constant dense<0xFF800000> : vector<128xf32>
    %7 = vector.multi_reduction <maximumf>, %4, %cst [0] : vector<4x128xf32> to vector<128xf32>
    %8 = vector.shape_cast %7 : vector<128xf32> to vector<1x128xf32>
    %9 = vector.broadcast %8 : vector<1x128xf32> to vector<4x128xf32>
    %10 = arith.subf %4, %9 : vector<4x128xf32>
    %11 = math.exp %10 : vector<4x128xf32>
    %cst_6 = arith.constant dense<0.000000e+00> : vector<128xf32>
    %12 = vector.multi_reduction <add>, %11, %cst_6 [0] : vector<4x128xf32> to vector<128xf32>
    %13 = vector.shape_cast %12 : vector<128xf32> to vector<1x128xf32>
    %14 = math.log %13 : vector<1x128xf32>
    %15 = tpu.iota {dimensions = array<i32: 0>} : vector<4x1xi32>
    %16 = tpu.iota {dimensions = array<i32: 1>} : vector<1x128xi32>
    %c128_i32 = arith.constant 128 : i32
    %17 = arith.muli %arg1, %c128_i32 : i32
    %18 = vector.broadcast %17 : i32 to vector<1x128xi32>
    %19 = arith.addi %18, %16 : vector<1x128xi32>
    %c256_i32 = arith.constant 256 : i32
    %20 = vector.broadcast %c256_i32 : i32 to vector<1x128xi32>
    %21 = arith.cmpi slt, %19, %20 : vector<1x128xi32>
    %22 = vector.broadcast %15 : vector<4x1xi32> to vector<4x128xi32>
    %23 = vector.broadcast %6 : vector<1x128xi32> to vector<4x128xi32>
    %24 = arith.cmpi eq, %22, %23 : vector<4x128xi32>
    %25 = vector.broadcast %21 : vector<1x128xi1> to vector<4x128xi1>
    %26 = arith.andi %24, %25 : vector<4x128xi1>
    %cst_7 = arith.constant 0.000000e+00 : f32
    %27 = vector.broadcast %cst_7 : f32 to vector<4x128xf32>
    %28 = arith.select %26, %4, %27 : vector<4x128xi1>, vector<4x128xf32>
    %cst_8 = arith.constant dense<0.000000e+00> : vector<128xf32>
    %29 = vector.multi_reduction <add>, %28, %cst_8 [0] : vector<4x128xf32> to vector<128xf32>
    %30 = vector.shape_cast %29 : vector<128xf32> to vector<1x128xf32>
    %31 = arith.subf %30, %8 : vector<1x128xf32>
    %32 = arith.subf %31, %14 : vector<1x128xf32>
    %cst_9 = arith.constant 1.000000e+00 : f32
    %cst_10 = arith.constant 0.000000e+00 : f32
    %33 = vector.broadcast %cst_9 : f32 to vector<4x128xf32>
    %34 = vector.broadcast %cst_10 : f32 to vector<4x128xf32>
    %35 = arith.select %26, %33, %34 : vector<4x128xi1>, vector<4x128xf32>
    %cst_11 = arith.constant 0.000000e+00 : f32
    %36 = vector.shape_cast %32 : vector<1x128xf32> to vector<1x128xf32>
    %37 = vector.broadcast %36 : vector<1x128xf32> to vector<4x128xf32>
    %38 = vector.broadcast %cst_11 : f32 to vector<4x128xf32>
    %39 = arith.select %26, %37, %38 : vector<4x128xi1>, vector<4x128xf32>
    %c0_12 = arith.constant 0 : index
    %c0_13 = arith.constant 0 : index
    %40 = vector.load %arg6[%c0_12, %c0_13] : memref<4x128xf32, #tpu.memory_space<vmem>>, vector<4x128xf32>
    %41 = arith.addf %40, %35 : vector<4x128xf32>
    %c0_14 = arith.constant 0 : index
    %c0_15 = arith.constant 0 : index
    %42 = vector.load %arg6[%c0_14, %c0_15] : memref<4x128xf32, #tpu.memory_space<vmem>>, vector<4x128xf32>
    tpu.vector_store %arg6[%c0_14, %c0_15], %41 {strides = array<i32>} : memref<4x128xf32, #tpu.memory_space<vmem>>, vector<4x128xf32>,
    %c0_16 = arith.constant 0 : index
    %c0_17 = arith.constant 0 : index
    %43 = vector.load %arg5[%c0_16, %c0_17] : memref<4x128xf32, #tpu.memory_space<vmem>>, vector<4x128xf32>
    %44 = arith.addf %43, %39 : vector<4x128xf32>
    %c0_18 = arith.constant 0 : index
    %c0_19 = arith.constant 0 : index
    %45 = vector.load %arg5[%c0_18, %c0_19] : memref<4x128xf32, #tpu.memory_space<vmem>>, vector<4x128xf32>
    tpu.vector_store %arg5[%c0_18, %c0_19], %44 {strides = array<i32>} : memref<4x128xf32, #tpu.memory_space<vmem>>, vector<4x128xf32>,
    %c1_i32 = arith.constant 1 : i32
    %46 = arith.cmpi eq, %arg1, %c1_i32 : i32
    %47 = arith.extui %46 : i1 to i32
    %c0_i32_20 = arith.constant 0 : i32
    %48 = arith.cmpi ne, %47, %c0_i32_20 : i32
    scf.if %48 {
      %c0_21 = arith.constant 0 : index
      %c0_22 = arith.constant 0 : index
      %49 = vector.load %arg6[%c0_21, %c0_22] : memref<4x128xf32, #tpu.memory_space<vmem>>, vector<4x128xf32>
      %cst_23 = arith.constant dense<0.000000e+00> : vector<4xf32>
      %50 = vector.multi_reduction <add>, %49, %cst_23 [1] : vector<4x128xf32> to vector<4xf32>
      %51 = vector.shape_cast %50 : vector<4xf32> to vector<4x1xf32>
      %c0_24 = arith.constant 0 : index
      %c0_25 = arith.constant 0 : index
      %52 = vector.load %arg5[%c0_24, %c0_25] : memref<4x128xf32, #tpu.memory_space<vmem>>, vector<4x128xf32>
      %cst_26 = arith.constant dense<0.000000e+00> : vector<4xf32>
      %53 = vector.multi_reduction <add>, %52, %cst_26 [1] : vector<4x128xf32> to vector<4xf32>
      %54 = vector.shape_cast %53 : vector<4xf32> to vector<4x1xf32>
      %55 = vector.shape_cast %51 : vector<4x1xf32> to vector<1x4x1xf32>
      %cst_27 = arith.constant dense<0.000000e+00> : vector<1xf32>
      %56 = vector.multi_reduction <add>, %55, %cst_27 [1, 2] : vector<1x4x1xf32> to vector<1xf32>
      %57 = vector.shape_cast %56 : vector<1xf32> to vector<1x1x1xf32>
      %58 = vector.extract %57[0, 0, 0] : f32 from vector<1x1x1xf32>
      %cst_28 = arith.constant 1.000000e+00 : f32
      %59 = arith.maximumf %58, %cst_28 : f32
      %60 = vector.broadcast %59 : f32 to vector<4x1xf32>
      %61 = arith.divf %51, %60 : vector<4x1xf32>
      %cst_29 = arith.constant 0.000000e+00 : f32
      %62 = vector.broadcast %cst_29 : f32 to vector<4x1xf32>
      %63 = arith.cmpf one, %61, %62 : vector<4x1xf32>
      %cst_30 = arith.constant 1.000000e+00 : f32
      %64 = vector.broadcast %cst_30 : f32 to vector<4x1xf32>
      %65 = arith.subf %64, %61 : vector<4x1xf32>
      %cst_31 = arith.constant 1.000000e+00 : f32
      %66 = vector.broadcast %cst_31 : f32 to vector<4x1xf32>
      %67 = arith.mulf %66, %65 : vector<4x1xf32>
      %cst_32 = arith.constant 0.000000e+00 : f32
      %68 = vector.broadcast %cst_32 : f32 to vector<4x1xf32>
      %69 = arith.select %63, %67, %68 : vector<4x1xi1>, vector<4x1xf32>
      %cst_33 = arith.constant 1.000000e+00 : f32
      %70 = vector.broadcast %cst_33 : f32 to vector<4x1xf32>
      %71 = arith.addf %69, %70 : vector<4x1xf32>
      %72 = arith.mulf %71, %54 : vector<4x1xf32>
      %73 = vector.shape_cast %72 : vector<4x1xf32> to vector<1x4x1xf32>
      %cst_34 = arith.constant dense<0.000000e+00> : vector<1xf32>
      %74 = vector.multi_reduction <add>, %73, %cst_34 [1, 2] : vector<1x4x1xf32> to vector<1xf32>
      %75 = vector.shape_cast %74 : vector<1xf32> to vector<1x1x1xf32>
      %76 = vector.extract %75[0, 0, 0] : f32 from vector<1x1x1xf32>
      %77 = arith.mulf %71, %51 : vector<4x1xf32>
      %78 = vector.shape_cast %77 : vector<4x1xf32> to vector<1x4x1xf32>
      %cst_35 = arith.constant dense<0.000000e+00> : vector<1xf32>
      %79 = vector.multi_reduction <add>, %78, %cst_35 [1, 2] : vector<1x4x1xf32> to vector<1xf32>
      %80 = vector.shape_cast %79 : vector<1xf32> to vector<1x1x1xf32>
      %81 = vector.extract %80[0, 0, 0] : f32 from vector<1x1x1xf32>
      %cst_36 = arith.constant 0.000000e+00 : f32
      %82 = arith.cmpf ogt, %81, %cst_36 : f32
      %cst_37 = arith.constant 0.000000e+00 : f32
      %83 = arith.subf %cst_37, %76 : f32
      %84 = arith.divf %83, %81 : f32
      %cst_38 = arith.constant 0.000000e+00 : f32
      %85 = arith.select %82, %84, %cst_38 : f32
      %cst_39 = arith.constant 0.000000e+00 : f32
      %86 = vector.broadcast %cst_39 : f32 to vector<1x1x1xf32>
      %87 = vector.broadcast %85 : f32 to vector<1x1x1xf32>
      %88 = arith.addf %86, %87 : vector<1x1x1xf32>
      %c0_40 = arith.constant 0 : index
      %c0_41 = arith.constant 0 : index
      %c0_42 = arith.constant 0 : index
      %89 = vector.load %arg4[%c0_40, %c0_41, %c0_42] : memref<1x1x1xf32, #tpu.memory_space<vmem>>, vector<1x1x1xf32>
      tpu.vector_store %arg4[%c0_40, %c0_41, %c0_42], %88 {strides = array<i32>} : memref<1x1x1xf32, #tpu.memory_space<vmem>>, vector<1x1x1xf32>,
    } else {
    }
    return
  }
  func.func @transform_0(%arg0: i32, %arg1: i32) -> (i32, i32, i32) {
    %c0_i32 = arith.constant 0 : i32
    %c0_i32_0 = arith.constant 0 : i32
    return %arg0, %c0_i32, %arg1 : i32, i32, i32
  }
  func.func @transform_1(%arg0: i32, %arg1: i32) -> (i32, i32, i32) {
    %c0_i32 = arith.constant 0 : i32
    %c0_i32_0 = arith.constant 0 : i32
    return %arg0, %c0_i32, %arg1 : i32, i32, i32
  }
  func.func @transform_2(%arg0: i32, %arg1: i32) -> (i32, i32, i32) {
    %c0_i32 = arith.constant 0 : i32
    %c0_i32_0 = arith.constant 0 : i32
    %c0_i32_1 = arith.constant 0 : i32
    return %arg0, %c0_i32, %c0_i32_0 : i32, i32, i32
  }
}

</mosaic_0001>

<bundles_post_ra>
// kernel: tpu_custom_call.1
= control target key start
LH: loop header
LB: loop body
LE: loop exit
PB: predicated region body
PF: predicated region fallthrough
CT: control target
= control target key end

     0   :  { %7 = vsyncpa [#allocation5], 0  ;;  %s872_s0 = inlined_call_operand.hbm [shape: f32[2,4,256], index: 0, kind: input, shape index: {}]   ;;  %s873_s1 = inlined_call_operand.hbm [shape: s32[2,1,256], index: 1, kind: input, shape index: {}]   ;;  %s874_s2 = inlined_call_operand.vmem [shape: f32[2,1,1], index: 2, kind: output, shape index: {}]  }
   0x1   :  { %9 = vsyncpa [#allocation5 + $0x1], 0 }
   0x2   :  { %10 = vsyncpa [#allocation7], 0 }
   0x3   :  { %12 = vsyncpa [#allocation7 + $0x1], 0  ;;  %s691_s9 = smov 0   ;;  %s693_s10 = smov 0  }
   0x4   :  { %s695_s11 = smov 0   ;;  %s697_s12 = smov 0  }
   0x5   :  { %s699_s13 = smov 0   ;;  %s701_s14 = smov 0  }
   0x6   :  { %s703_s15 = smov 0   ;;  %s705_s16 = smov 0  }
   0x7 LB: > { %s431_s17 = sadd.s32 4294967295, %s669_s16   ;;  %s27_s18 = sadd.s32 1, %s661_s14  ;;  %s669_s16 = sphi %s705_s16, %s18_s16   ;;  %s665_s15 = sphi %s703_s15, %s887_s15   ;;  %s661_s14 = sphi %s701_s14, %s886_s14   ;;  %s657_s13 = sphi %s699_s13, %s885_s13   ;;  %s653_s12 = sphi %s697_s12, %s884_s12   ;;  %s649_s11 = sphi %s695_s11, %s883_s11   ;;  %s645_s10 = sphi %s693_s10, %s882_s10   ;;  %s641_s9 = sphi %s691_s9, %s881_s9  }
   0x8   : > { %p28_p0 = scmp.ge.s32.totalorder %s27_s18, 2  ;;  %s30_s19 = sadd.s32 1, %s665_s15 }
   0x9   : > { %s39_s20 = sadd.s32 1, %s649_s11  ;;  %p46_p1 = scmp.ne.s32.totalorder %s649_s11, %s645_s10 }
   0xa   : > { %s889_s18 = smov (%p28_p0, %s27_s18), 0  ;;  %s891_s19 = smov (!%p28_p0, %s30_s19), %s665_s15 }
   0xb   : > { %s35_s21 = ssub.s32 %s661_s14, %s889_s18  ;;  %p47_p2 = scmp.eq.s32.totalorder %s669_s16, 0 }
   0xc   : > { %p32_p3 = scmp.ge.s32.totalorder %s891_s19, 2  ;;  %p52_p4 = scmp.ne.s32.totalorder %s645_s10, %s641_s9 }
   0xd   : > { %p742_p5 = por %p47_p2, %p46_p1  ;;  %p53_p6 = scmp.eq.s32.totalorder %s431_s17, 0 }
   0xe   : > { %s893_s19 = smov (%p32_p3, %s891_s19), 0  ;;  %p467_p8 = scmp.lt.s32.totalorder %s669_s16, 4 }
   0xf   : > { %p748_p7 = por %p53_p6, %p52_p4  ;;  %s34_s24 = ssub.s32 %s665_s15, %s893_s19 }
  0x10   : > { %s36_s25 = sor.u32 %s35_s21, %s34_s24  ;;  %s756_s26 = sand.u32 1, %s649_s11  }
  0x11   : > { %p37_p9 = scmp.eq.s32.totalorder %s36_s25, 0  ;;  %s435_s27 = sshll.u32 %s756_s26, 2 }
  0x12   : > { %s436_s28 = sshll.u32 %s665_s15, 1  ;;  %s134_s4 = scalar_lea.vmem [#allocation4], %s435_s27 }
  0x13   : > { %s761_s29 = scalar_select %p37_p9, %s649_s11, %s39_s20  }
  0x14   : > { %s139_s30 = sadd.s32 %s661_s14, %s436_s28  ;;  %s143_s5 = sshll.u32 %s134_s4, 4  ;;  %s144_s5 = int_to_ptr.vmem [resolvable:$true] %s143_s5 }
  0x15   : > { %s437_s3 = sshll.u32 %s139_s30, 6  ;;  %p771_p10 = pnand %p467_p8, %p742_p5 }
  0x16   : > { %s141_s8 = scalar_lea.hbm %s872_s0, %s437_s3  ;;  %p440_p11 = scmp.ge.s32.totalorder %s669_s16, 1 }
  0x17   : > { %p167_p12 = scmp.lt.s32.totalorder %s669_s16, 5  ;;  %s131_s17 = scalar_lea.sflag [#allocation5], %s756_s26 }
  0x18   : > { %p545_p13 = pneg %p771_p10  ;;  %s556_s20 = scalar_lea.vmem %s144_s5, 64 }
  0x19   : > { %p557_p0 = scmp.ne.s32.totalorder %s144_s5, %s556_s20  ;;  %s671_s21 = smov [#allocation4]  }
  0x1a   : > { %s561_s22 = sshll.u32 %s671_s21, 4  ;;  %s562_s22 = int_to_ptr.vmem [resolvable:$false] %s561_s22 }
  0x1b   : > { %p559_p1 = pnand %p557_p0, %p545_p13  ;;  %s563_s24 = scalar_lea.vmem %s562_s22, 128 }
  0x1c   : > { %p564_p3 = scmp.lt.s32.totalorder %s144_s5, %s562_s22  ;;  %p565_p4 = scmp.lt.s32.totalorder %s563_s24, %s556_s20 }
  0x1d   : > { %p560_p2 = pneg %p559_p1 }
  0x1e   : > { %p566_p5 = por %p565_p4, %p564_p3 }
  0x20   : > { %p567_p6 = pnand %p566_p5, %p560_p2 }
  0x22   : > { %570 = shalt.err (!%p567_p6)
}
  0x23   : > { %463 = dma.hbm_to_vmem [thread:$0]  (!%p771_p10), %s141_s8, 64, %s144_s5, %s131_s17  }
  0x24   : > { %p789_p8 = pnand %p440_p11, %p167_p12  ;;  %s439_s27 = sshll.u32 %s139_s30, 4 }
  0x25   : > { %s160_s4 = scalar_lea.hbm %s873_s1, %s439_s27  ;;  %s153_s6 = scalar_lea.vmem [#allocation6], %s756_s26 }
  0x26   : > { %s162_s7 = sshll.u32 %s153_s6, 4  ;;  %s151_s20 = scalar_lea.sflag [#allocation7], %s756_s26  ;;  %s163_s7 = int_to_ptr.vmem [resolvable:$true] %s162_s7 }
  0x27   : > { %s584_s21 = scalar_lea.vmem %s163_s7, 16  ;;  %s672_s5 = smov [#allocation6]  }
  0x28   : > { %p585_p9 = scmp.ne.s32.totalorder %s163_s7, %s584_s21  ;;  %s589_s8 = sshll.u32 %s672_s5, 4  ;;  %s590_s8 = int_to_ptr.vmem [resolvable:$false] %s589_s8 }
  0x29   : > { %s591_s17 = scalar_lea.vmem %s590_s8, 32  ;;  %p592_p11 = scmp.lt.s32.totalorder %s163_s7, %s590_s8 }
  0x2a   : > { %p587_p0 = pnand %p585_p9, %p545_p13  ;;  %p593_p12 = scmp.lt.s32.totalorder %s591_s17, %s584_s21 }
  0x2c   : > { %p588_p1 = pneg %p587_p0  ;;  %p594_p2 = por %p593_p12, %p592_p11 }
  0x2e   : > { %p595_p3 = pnand %p594_p2, %p588_p1 }
  0x30   : > { %598 = shalt.err (!%p595_p3)
}
  0x31   : > { %466 = dma.hbm_to_vmem [thread:$0]  (!%p771_p10), %s160_s4, 16, %s163_s7, %s151_s20  }
  0x32   : > { %171 = sbr.rel (%p789_p8) target bundleno = 772 (0x304), region = 28  ;;  %s173_s26 = sand.u32 (!%p789_p8), 1, %s645_s10  }
  0x33   : > { %s441_s30 = sshll.u32 (!%p789_p8), %s173_s26, 2  ;;  %s174_s22 = scalar_lea.sflag (!%p789_p8), [#allocation5], %s173_s26 }
  0x34   : > { %s177_s24 = scalar_lea.vmem (!%p789_p8), [#allocation4], %s441_s30 }
  0x37   : > { %632 = dma.done.wait (%p748_p7), %s174_s22, 64  }
  0x38   : > { %634 = vsyncadd (%p748_p7), %s174_s22, 4294967232  ;;  %s183_s27 = scalar_lea.sflag [#allocation7], %s173_s26  ;;  %s185_s28 = scalar_lea.vmem [#allocation6], %s173_s26 }
  0x39   : > { %636 = dma.done.wait (%p748_p7), %s183_s27, 16  }
  0x3a   : > { %638 = vsyncadd (%p748_p7), %s183_s27, 4294967280  ;;  %p208_p10 = scmp.lt.s32.totalorder %s657_s13, 1  ;;  %p442_p13 = scmp.ne.s32.totalorder %s653_s12, 0 }
  0x3c   : > { %s895_s13 = smov (!%p208_p10, %s657_s13), 1  ;;  %214 = sbr.rel (%p442_p13) target bundleno = 67 (0x43), region = 40 }
  0x3d   : > { %s210_s3 = scalar_lea.vmem %s874_s2, %s895_s13 }
  0x41   : > { %v673_v0 = vmov 0.0  }
  0x42   : > { %215 = vst [vmem:[#allocation2] sm:$0xf] %v673_v0  ;;  %216 = vst [vmem:[#allocation3] sm:$0xf] %v673_v0 }
  0x43 PF: > { %v217_v1 = vld [vmem:[%s177_s24] sm:$0xf]  ;;  %vm219_vm0 = vcmask 1043456   ;;  %v239_v2 = vlaneseq  ;;  %s443_s23 = sshll.u32 %s653_s12, 7  ;;  %v444_v3 = vld [vmem:[%s185_s28] ss:$0 sm:$0xff] }
  0x44   : > { %v220_v4 = vsel %vm219_vm0, %v217_v1, -inf  ;;  %v244_v5 = vstv %s443_s23  ;;  %v674_v14 = vmov 0.0   ;;  %p445_p7 = scmp.ne.s32.totalorder %s653_s12, 1 }
  0x45   : > { %v221_v6 = vrot.slane %v220_v4, 4  ;;  %v240_v7 = vshrl.u32 %v239_v2, 7  ;;  %v242_v8 = vand.u32 127, %v239_v2  ;;  %s675_s4 = smov (!%p445_p7), 1.0  }
  0x47   : > { %v245_v9 = vadd.s32 %v244_v5, %v242_v8  ;;  %vm251_vm1 = vcmp.eq.s32.totalorder %v240_v7, %v444_v3  ;;  %v222_v10 = vmax.f32 %v220_v4, %v221_v6 }
  0x49   : > { %vm246_vm2 = vcmp.lt.s32.totalorder %v245_v9, 256  ;;  %v267_v11 = vld [vmem:[#allocation3] sm:$0xf]  ;;  %v223_v12 = vrot.slane %v222_v10, 2  ;;  %v270_v42 = vld [vmem:[#allocation2] sm:$0xf] }
  0x4a   : > { %vm825_vm3 = vmand %vm251_vm1, %vm246_vm2 }
  0x4b   : > { %v265_v15 = vsel %vm825_vm3, 1.0, %v674_v14  ;;  %v224_v16 = vmax.f32 %v222_v10, %v223_v12  ;;  %v255_v22 = vsel %vm825_vm3, %v217_v1, 0.0 }
  0x4c   : > { %v268_v17 = vadd.f32 %v267_v11, %v265_v15  ;;  %v256_v23 = vsel %vm219_vm0, %v255_v22, 0.0 }
  0x4d   : > { %v225_v18 = vrot.slane %v224_v16, 1  ;;  %v257_v26 = vrot.slane %v256_v23, 4 }
  0x4e   : > { %269 = vst [vmem:[#allocation3] sm:$0xf] %v268_v17 }
  0x4f   : > { %v226_v19 = vmax.f32 %v224_v16, %v225_v18  ;;  %v258_v29 = vadd.f32 %v257_v26, %v256_v23 }
  0x51   : > { %v227_v20 = vsub.f32 %v217_v1, %v226_v19  ;;  %v259_v32 = vrot.slane %v258_v29, 2 }
  0x53   : > { %v228_v21 = vmul.f32 1.442695, %v227_v20  ;;  %v260_v35 = vadd.f32 %v259_v32, %v258_v29 }
  0x55   : > { %535 = vpow2.f32 %v228_v21  ;;  %v261_v36 = vrot.slane %v260_v35, 1 }
  0x57   : > { %v262_v37 = vadd.f32 %v261_v36, %v260_v35 }
  0x59   : > { %v263_v38 = vsub.f32 %v262_v37, %v226_v19 }
  0x62   : > { %v536_v24 = vpop.eup %535 }
  0x63   : > { %v230_v25 = vsel %vm219_vm0, %v536_v24, 0.0 }
  0x64   : > { %v231_v27 = vrot.slane %v230_v25, 4 }
  0x66   : > { %v232_v28 = vadd.f32 %v231_v27, %v230_v25 }
  0x68   : > { %v233_v30 = vrot.slane %v232_v28, 2 }
  0x6a   : > { %v234_v31 = vadd.f32 %v233_v30, %v232_v28 }
  0x6c   : > { %v235_v33 = vrot.slane %v234_v31, 1 }
  0x6e   : > { %v236_v34 = vadd.f32 %v235_v33, %v234_v31 }
  0x70   : > { %537 = vlog2.f32 %v236_v34 }
  0x7d   : > { %v538_v39 = vpop.eup %537 }
  0x7e   : > { %v238_v40 = vmul.f32 0.6931472, %v538_v39 }
  0x80   : > { %v264_v41 = vsub.f32 %v263_v38, %v238_v40 }
  0x81   : > { %276 = sbr.rel (%p445_p7) target bundleno = 772 (0x304), region = 44 }
  0x82   : > { %v266_v43 = vsel %vm825_vm3, %v264_v41, 0.0 }
  0x83   : > { %v271_v44 = vadd.f32 %v270_v42, %v266_v43 }
  0x85   : > { %272 = vst [vmem:[#allocation2] sm:$0xf] %v271_v44 }
  0x86   : > { %v277_v45 = vld [vmem:[#allocation3] sm:$0xf]  ;;  %vm285_vm4 = vcmask 3072   ;;  %vm335_vm6 = vcmask 0  }
  0x87   : > { %v278_v46 = vsel %vm219_vm0, %v277_v45, 0.0 }
  0x88   : > { %279 = vadd.xlane.f32.xlu0 %v278_v46 }
  0x8c   : > { %v281_v47 = vld [vmem:[#allocation2] sm:$0xf] }
  0x8d   : > { %v282_v48 = vsel %vm219_vm0, %v281_v47, 0.0 }
  0x8e   : > { %283 = vadd.xlane.f32.xlu1 %v282_v48 }
 0x111   : > { %v280_v49 = vpop.xlane.xlu0 %279 }
 0x112   : > { %v286_v50 = vsel %vm285_vm4, %v280_v49, 0.0 }
 0x113   : > { %287 = vadd.xlane.f32.xlu0 %v286_v50 }
 0x117   : > { %v284_v62 = vpop.xlane.xlu1 %283 }
 0x19c   : > { %v288_v51 = vpop.xlane.xlu0 %287 }
 0x19d   : > { %v289_v52 = vrot.slane %v288_v51, 4 }
 0x19f   : > { %v290_v53 = vadd.f32 %v289_v52, %v288_v51 }
 0x1a1   : > { %v291_v54 = vrot.slane %v290_v53, 2 }
 0x1a3   : > { %v292_v55 = vadd.f32 %v291_v54, %v290_v53 }
 0x1a5   : > { %v293_v56 = vrot.slane %v292_v55, 1 }
 0x1a7   : > { %v294_v57 = vadd.f32 %v293_v56, %v292_v55 }
 0x1a9   : > { %448 = vpush %v294_v57 }
 0x1da   : > { %s449_s12 = spop %448 }
 0x1db   : > { %s296_s6 = smax.f32 %s675_s4, %s449_s12 }
 0x1dc   : > { %v297_v58 = vstv %s296_s6 }
 0x1dd   : > { %539 = vrcp.f32 %v297_v58 }
 0x1ea   : > { %v540_v59 = vpop.eup %539 }
 0x1eb   : > { %v299_v60 = vmul.f32 %v540_v59, %v280_v49 }
 0x1ed   : > { %vm300_vm5 = vcmp.ne.f32.partialorder %v299_v60, 0.0  ;;  %v301_v61 = vsub.f32 1.0, %v299_v60 }
 0x1ef   : > { %v302_v63 = vsel %vm300_vm5, %v301_v61, 0.0 }
 0x1f0   : > { %v303_v0 = vadd.f32 1.0, %v302_v63 }
 0x1f2   : > { %v304_v1 = vmul.f32 %v303_v0, %v284_v62  ;;  %v315_v2 = vmul.f32 %v303_v0, %v280_v49 }
 0x1f4   : > { %v316_v3 = vsel %vm285_vm4, %v315_v2, 0.0  ;;  %v305_v4 = vsel %vm285_vm4, %v304_v1, 0.0 }
 0x1f5   : > { %317 = vadd.xlane.f32.xlu0 %v316_v3  ;;  %306 = vadd.xlane.f32.xlu1 %v305_v4 }
 0x27e   : > { %v318_v5 = vpop.xlane.xlu0 %317  ;;  %v307_v6 = vpop.xlane.xlu1 %306 }
 0x27f   : > { %v319_v7 = vrot.slane %v318_v5, 4  ;;  %v308_v8 = vrot.slane %v307_v6, 4 }
 0x281   : > { %v320_v9 = vadd.f32 %v319_v7, %v318_v5  ;;  %v309_v10 = vadd.f32 %v308_v8, %v307_v6 }
 0x283   : > { %v321_v11 = vrot.slane %v320_v9, 2  ;;  %v310_v12 = vrot.slane %v309_v10, 2 }
 0x285   : > { %v322_v13 = vadd.f32 %v321_v11, %v320_v9  ;;  %v311_v14 = vadd.f32 %v310_v12, %v309_v10 }
 0x287   : > { %v312_v15 = vrot.slane %v311_v14, 1  ;;  %v323_v16 = vrot.slane %v322_v13, 1 }
 0x289   : > { %v313_v17 = vadd.f32 %v312_v15, %v311_v14  ;;  %v324_v18 = vadd.f32 %v323_v16, %v322_v13 }
 0x28b   : > { %450 = vpush %v313_v17 }
 0x28c   : > { %452 = vpush %v324_v18 }
 0x2bc   : > { %s451_s7 = spop %450 }
 0x2bd   : > { %s453_s20 = spop %452  ;;  %s327_s21 = ssub.f32 0.0, %s451_s7 }
 0x2be   : > { %v328_v19 = vstv %s453_s20  ;;  %p326_p4 = scmp.gt.f32.partialorder %s453_s20, 0.0 }
 0x2bf   : > { %541 = vrcp.f32 %v328_v19 }
 0x2cc   : > { %v542_v20 = vpop.eup %541 }
 0x2cd   : > { %454 = vpush %v542_v20 }
 0x2fe   : > { %s455_s5 = spop %454 }
 0x2ff   : > { %s331_s8 = smul.f32 %s455_s5, %s327_s21 }
 0x301   : > { %s897_s8 = smov (!%p326_p4, %s331_s8), 0.0 }
 0x302   : > { %v333_v21 = vstv %s897_s8 }
 0x303   : > { %336 = vst.msk [vmem:[%s210_s3] sm:$0x1] %vm335_vm6, %v333_v21 }
 0x304 PF: > { %s18_s16 = sadd.s32 1, %s669_s16   ;;  %s881_s9 = smov %s645_s10 }
 0x305   : > { %p15_p5 = scmp.ge.s32.totalorder %s18_s16, 6   ;;  %s882_s10 = smov %s649_s11 }
 0x306   : > { %s883_s11 = smov %s761_s29  ;;  %s884_s12 = smov %s661_s14 }
 0x307   : > { %s885_s13 = smov %s665_s15  ;;  %s886_s14 = smov %s889_s18 }
 0x308   : > { %s887_s15 = smov %s893_s19  ;;  %17 = sbr.rel (!%p15_p5) target bundleno = 7 (0x7), region = 89 }
 0x30d   :  { %354 = vsyncpa [#allocation5], 1 }
 0x30e   :  { %356 = vsyncpa [#allocation5 + $0x1], 1 }
 0x30f   :  { %357 = vsyncpa [#allocation7], 1 }
 0x310   :  { %359 = vsyncpa [#allocation7 + $0x1], 1 }

</bundles_post_ra>
